<compile_context>
chip_gen: v7x
topology: tpu7x:2x2x1
jax: 0.10.0
libtpu: 0.0.40
codegen_flags: <defaults>
</compile_context>

<pallas_src>
import functools

import jax
import jax.numpy as jnp
from jax.experimental import pallas as pl
from jax.experimental.pallas import tpu as pltpu

HIDDEN = 256      # fuse layer width
NUM_CAT = 26
NUM_CONT = 3
HEAD_PAD = 128    # fused head output lanes (26 cat + 3 cont, zero-padded to 128)
BN_EPS = 1e-5

# Conservative budget for the double-buffered activation/output tiles: fits
# comfortably under v5e's 16 MiB scoped-VMEM default (v6e/v7x default to 32 MiB).
VMEM_TILE_BUDGET = 12 * 1024 * 1024


def _round_up(x, m):
    return (x + m - 1) // m * m


def emotic_kernel(ctx_ref, body_ref, wc_ref, wb_ref, bf_ref, wh_ref, bh_ref,
                  out_ref):
    # Folded (backbone proj + fuse Linear + eval BatchNorm) affine, then ReLU.
    # Two MXU dots (context / body streams) replace the concatenated activation.
    h = (
        jnp.dot(ctx_ref[...], wc_ref[...], preferred_element_type=jnp.float32)
        + jnp.dot(body_ref[...], wb_ref[...], preferred_element_type=jnp.float32)
        + bf_ref[...]
    )
    h = jnp.maximum(h, 0.0)
    # Dropout(p=0.5) == identity in inference.
    # Fused heads: [fc_cat | fc_cont | zero-pad] -> one lane-dense 128-wide store.
    out_ref[...] = (
        jnp.dot(h.astype(wh_ref.dtype), wh_ref[...],
                preferred_element_type=jnp.float32)
        + bh_ref[...]
    ).astype(out_ref.dtype)


def fold_params(params):
    """Fold backbone proj + fuse Linear + eval BN into one affine per stream,
    fuse the two heads into one 128-lane-padded weight."""
    # cat((ctx@wc+bc, body@wb+bb),1) @ W1 + b1
    #   == ctx @ (wc@w1c) + body @ (wb@w1b) + (bc@w1c + bb@w1b + b1)
    wc_f = params["wc"] @ params["w1c"]                                    # [Cc,256]
    wb_f = params["wb"] @ params["w1b"]                                    # [Cb,256]
    b_f = params["bc"] @ params["w1c"] + params["bb"] @ params["w1b"] + params["b1"]
    # BN (eval): y = (x - mean) * gamma * rsqrt(var + eps) + beta
    scale = params["gamma"] * jax.lax.rsqrt(params["var"] + BN_EPS)        # [1,256]
    shift = params["beta"] - params["mean"] * scale
    wc_f = wc_f * scale
    wb_f = wb_f * scale
    b_fuse = b_f * scale + shift                                           # [1,256]

    def pad_rows(w):
        # Zero-pad the contraction dim to a 128 multiple (MXU K alignment).
        k = w.shape[0]
        kp = max(128, _round_up(k, 128))
        return jnp.pad(w, ((0, kp - k), (0, 0)))

    # Fused heads, zero-padded to a single 128-lane-wide output slab.
    w_head = jnp.zeros((HIDDEN, HEAD_PAD), jnp.float32)
    w_head = w_head.at[:, :NUM_CAT].set(params["wcat"])
    w_head = w_head.at[:, NUM_CAT:NUM_CAT + NUM_CONT].set(params["wcont"])
    b_head = jnp.zeros((1, HEAD_PAD), jnp.float32)
    b_head = b_head.at[:, :NUM_CAT].set(params["bcat"])
    b_head = b_head.at[:, NUM_CAT:NUM_CAT + NUM_CONT].set(params["bcont"])

    # NOTE: if tighter accuracy is ever needed, keep the fold f32 and apply the
    # BN scale as an f32 per-column VPU multiply on h inside the kernel.
    return {
        "w_fuse_ctx": pad_rows(wc_f).astype(jnp.bfloat16),   # bf16 weights
        "w_fuse_body": pad_rows(wb_f).astype(jnp.bfloat16),  # f32 accumulation
        "b_fuse": b_fuse,                                    # biases stay f32
        "w_head": w_head.astype(jnp.bfloat16),
        "b_head": b_head,
    }


def _choose_tiling(batch, feat_ctx, feat_body, block_b):
    """Pick (tile_rows, padded_batch, weight_bytes, per_row_bytes):
    minimal batch padding, large tiles, VMEM-safe, >=2/even grid steps when
    there is enough work (v7x megacore)."""
    rows = _round_up(batch, 16)                       # bf16 sublane granularity
    # Bytes per tile-row of double-buffered bf16 tiles (2 inputs + 1 output).
    per_row = 2 * 2 * (feat_ctx + feat_body + HEAD_PAD)
    weight_bytes = (2 * (feat_ctx + feat_body) * HIDDEN + 4 * HIDDEN
                    + 2 * HIDDEN * HEAD_PAD + 4 * HEAD_PAD)
    tb_cap = (VMEM_TILE_BUDGET - weight_bytes) // per_row
    tb_cap = max(16, min(block_b, (tb_cap // 16) * 16))

    n_steps = pl.cdiv(rows, tb_cap)
    # Give the v7x megacore >= 2 steps when tiles stay >= 512 rows each.
    if n_steps == 1 and rows >= 1024:
        n_steps = 2
    # Prefer an even step count when it does not add batch padding.
    if n_steps > 1 and n_steps % 2 == 1:
        alt = n_steps + 1
        if (_round_up(pl.cdiv(rows, alt), 16) * alt
                <= _round_up(pl.cdiv(rows, n_steps), 16) * n_steps):
            n_steps = alt

    tb = _round_up(pl.cdiv(rows, n_steps), 16)
    n_steps = pl.cdiv(rows, tb)
    return tb, tb * n_steps, weight_bytes, per_row


def emotic_forward(x_context, x_body, folded, *, block_b=2048):
    """x_context, x_body: NCHW float32 images. Returns (cat [B,26], cont [B,3])."""
    B = x_context.shape[0]
    wc, wb = folded["w_fuse_ctx"], folded["w_fuse_body"]
    b_fuse, w_head, b_head = folded["b_fuse"], folded["w_head"], folded["b_head"]
    fc, fb = wc.shape[0], wb.shape[0]

    # Backbone GAP (glue): NCHW -> [B, C]; streams stay separate (no concat),
    # feature axes zero-padded to the weights' (128-aligned) contraction dims.
    ctx = jnp.mean(x_context, axis=(2, 3)).astype(jnp.bfloat16)
    body = jnp.mean(x_body, axis=(2, 3)).astype(jnp.bfloat16)

    tb, b_pad, weight_bytes, per_row = _choose_tiling(B, fc, fb, block_b)
    ctx = jnp.pad(ctx, ((0, b_pad - B), (0, fc - ctx.shape[1])))
    body = jnp.pad(body, ((0, b_pad - B), (0, fb - body.shape[1])))

    grid = (b_pad // tb,)
    flops = 2 * b_pad * ((fc + fb) * HIDDEN + HIDDEN * HEAD_PAD)
    bytes_accessed = (ctx.size + body.size + b_pad * HEAD_PAD) * 2 + weight_bytes
    vmem_limit = int(min(32 * 1024 * 1024,
                         max(16 * 1024 * 1024, 2 * (per_row * tb + weight_bytes))))

    # Constant-index_map operands: VMEM-resident, single-buffered.
    const = dict(pipeline_mode=pl.Buffered(1))

    out = pl.pallas_call(
        emotic_kernel,
        out_shape=jax.ShapeDtypeStruct((b_pad, HEAD_PAD), jnp.bfloat16),
        grid=grid,
        in_specs=[
            pl.BlockSpec((tb, fc), lambda i: (i, 0)),            # ctx: batch-tiled
            pl.BlockSpec((tb, fb), lambda i: (i, 0)),            # body: batch-tiled
            pl.BlockSpec((fc, HIDDEN), lambda i: (0, 0), **const),
            pl.BlockSpec((fb, HIDDEN), lambda i: (0, 0), **const),
            pl.BlockSpec((1, HIDDEN), lambda i: (0, 0), **const),
            pl.BlockSpec((HIDDEN, HEAD_PAD), lambda i: (0, 0), **const),
            pl.BlockSpec((1, HEAD_PAD), lambda i: (0, 0), **const),
        ],
        out_specs=pl.BlockSpec((tb, HEAD_PAD), lambda i: (i, 0)),
        compiler_params=pltpu.CompilerParams(
            dimension_semantics=("parallel",),                   # megacore on v7x
            vmem_limit_bytes=vmem_limit,                         # v5e: >16MiB default
        ),
        cost_estimate=pl.CostEstimate(
            flops=flops, transcendentals=0, bytes_accessed=bytes_accessed),
    )(ctx, body, wc, wb, b_fuse, w_head, b_head)

    out = out[:B].astype(jnp.float32)          # drop padded rows, upcast logits
    return out[:, :NUM_CAT], out[:, NUM_CAT:NUM_CAT + NUM_CONT]


def init_params(key, c_in, num_context_features, num_body_features, hidden=HIDDEN):
    ks = jax.random.split(key, 12)

    def lin(k, fan_in, fan_out):
        scale = 1.0 / jnp.sqrt(jnp.float32(fan_in))
        kw, kb = jax.random.split(k)
        w = jax.random.uniform(kw, (fan_in, fan_out), jnp.float32, -scale, scale)
        b = jax.random.uniform(kb, (1, fan_out), jnp.float32, -scale, scale)
        return w, b

    wc, bc = lin(ks[0], c_in, num_context_features)
    wb, bb = lin(ks[1], c_in, num_body_features)
    w1, b1 = lin(ks[2], num_context_features + num_body_features, hidden)
    wcat, bcat = lin(ks[3], hidden, NUM_CAT)
    wcont, bcont = lin(ks[4], hidden, NUM_CONT)

    return {
        "wc": wc, "bc": bc,
        "wb": wb, "bb": bb,
        "w1c": w1[:num_context_features, :],
        "w1b": w1[num_context_features:, :],
        "b1": b1,
        "gamma": jnp.ones((1, hidden), jnp.float32)
        + 0.1 * jax.random.normal(ks[5], (1, hidden), jnp.float32),
        "beta": 0.1 * jax.random.normal(ks[6], (1, hidden), jnp.float32),
        "mean": 0.1 * jax.random.normal(ks[7], (1, hidden), jnp.float32),
        "var": jnp.abs(jax.random.normal(ks[8], (1, hidden), jnp.float32)) + 0.5,
        "wcat": wcat, "bcat": bcat,
        "wcont": wcont, "bcont": bcont,
    }


def reference_forward(x_context, x_body, params):
    """Pure-JAX (unfolded, f32) reference matching the PyTorch module semantics."""
    ctx = jnp.mean(x_context, axis=(2, 3)) @ params["wc"] + params["bc"]
    body = jnp.mean(x_body, axis=(2, 3)) @ params["wb"] + params["bb"]
    pre = ctx @ params["w1c"] + body @ params["w1b"] + params["b1"]
    h = (pre - params["mean"]) * jax.lax.rsqrt(params["var"] + BN_EPS) \
        * params["gamma"] + params["beta"]
    h = jnp.maximum(h, 0.0)
    return h @ params["wcat"] + params["bcat"], h @ params["wcont"] + params["bcont"]


if __name__ == "__main__":
    key = jax.random.PRNGKey(0)
    k_ctx, k_body, k_param = jax.random.split(key, 3)

    B, C, H, W = 2, 4, 16, 16
    NUM_CONTEXT_FEATURES = 32
    NUM_BODY_FEATURES = 16

    x_context = jax.random.normal(k_ctx, (B, C, H, W), jnp.float32)
    x_body = jax.random.normal(k_body, (B, C, H, W), jnp.float32)
    params = init_params(k_param, C, NUM_CONTEXT_FEATURES, NUM_BODY_FEATURES)
    folded = fold_params(params)

    fwd = jax.jit(functools.partial(emotic_forward, folded=folded))
    cat_out, cont_out = fwd(x_context, x_body)
    jax.block_until_ready((cat_out, cont_out))

    assert cat_out.shape == (B, NUM_CAT) and cont_out.shape == (B, NUM_CONT)
    assert jnp.all(jnp.isfinite(cat_out)) and jnp.all(jnp.isfinite(cont_out))

    # Correctness vs. unfolded f32 reference (loose tol: bf16 weights/output).
    cat_ref, cont_ref = reference_forward(x_context, x_body, params)
    assert jnp.allclose(cat_out, cat_ref, rtol=1e-1, atol=1e-1)
    assert jnp.allclose(cont_out, cont_ref, rtol=1e-1, atol=1e-1)

    print("KERNEL_OK")
</pallas_src>

<mosaic_0001>
module attributes {stable_mosaic.version = 11 : i64} {
  func.func @emotic_kernel(%arg0: i32, %arg1: memref<16x128xbf16, #tpu.memory_space<vmem>>, %arg2: memref<16x128xbf16, #tpu.memory_space<vmem>>, %arg3: memref<128x256xbf16, #tpu.memory_space<vmem>>, %arg4: memref<128x256xbf16, #tpu.memory_space<vmem>>, %arg5: memref<1x256xf32, #tpu.memory_space<vmem>>, %arg6: memref<256x128xbf16, #tpu.memory_space<vmem>>, %arg7: memref<1x128xf32, #tpu.memory_space<vmem>>, %arg8: memref<16x128xbf16, #tpu.memory_space<vmem>>) attributes {dimension_semantics = [#tpu.dimension_semantics<parallel>], iteration_bounds = array<i64: 1>, scalar_prefetch = 0 : i64, scratch_operands = 0 : i64, tpu.core_type = #tpu.core_type<tc>, window_params = [{transform_indices = @transform_0, window_bounds = array<i64: 16, 128>}, {transform_indices = @transform_1, window_bounds = array<i64: 16, 128>}, {pipeline_mode = #tpu.pipeline_mode<synchronous>, transform_indices = @transform_2, window_bounds = array<i64: 128, 256>}, {pipeline_mode = #tpu.pipeline_mode<synchronous>, transform_indices = @transform_3, window_bounds = array<i64: 128, 256>}, {pipeline_mode = #tpu.pipeline_mode<synchronous>, transform_indices = @transform_4, window_bounds = array<i64: 1, 256>}, {pipeline_mode = #tpu.pipeline_mode<synchronous>, transform_indices = @transform_5, window_bounds = array<i64: 256, 128>}, {pipeline_mode = #tpu.pipeline_mode<synchronous>, transform_indices = @transform_6, window_bounds = array<i64: 1, 128>}, {transform_indices = @transform_7, window_bounds = array<i64: 16, 128>}]} {
    %c0 = arith.constant 0 : index
    %c0_0 = arith.constant 0 : index
    %0 = vector.load %arg1[%c0, %c0_0] : memref<16x128xbf16, #tpu.memory_space<vmem>>, vector<16x128xbf16>
    %c0_1 = arith.constant 0 : index
    %c0_2 = arith.constant 0 : index
    %1 = vector.load %arg3[%c0_1, %c0_2] : memref<128x256xbf16, #tpu.memory_space<vmem>>, vector<128x256xbf16>
    %cst = arith.constant dense<0.000000e+00> : vector<16x256xf32>
    %2 = tpu.matmul %0, %1, %cst {dimension_numbers = #tpu.dot_dimension_numbers<[1], [0], [0], [1], [0, 0, 1, 1], [], []>} : vector<16x128xbf16>, vector<128x256xbf16>, vector<16x256xf32> -> vector<16x256xf32>
    %c0_3 = arith.constant 0 : index
    %c0_4 = arith.constant 0 : index
    %3 = vector.load %arg2[%c0_3, %c0_4] : memref<16x128xbf16, #tpu.memory_space<vmem>>, vector<16x128xbf16>
    %c0_5 = arith.constant 0 : index
    %c0_6 = arith.constant 0 : index
    %4 = vector.load %arg4[%c0_5, %c0_6] : memref<128x256xbf16, #tpu.memory_space<vmem>>, vector<128x256xbf16>
    %cst_7 = arith.constant dense<0.000000e+00> : vector<16x256xf32>
    %5 = tpu.matmul %3, %4, %cst_7 {dimension_numbers = #tpu.dot_dimension_numbers<[1], [0], [0], [1], [0, 0, 1, 1], [], []>} : vector<16x128xbf16>, vector<128x256xbf16>, vector<16x256xf32> -> vector<16x256xf32>
    %6 = arith.addf %2, %5 : vector<16x256xf32>
    %c0_8 = arith.constant 0 : index
    %c0_9 = arith.constant 0 : index
    %7 = vector.load %arg5[%c0_8, %c0_9] : memref<1x256xf32, #tpu.memory_space<vmem>>, vector<1x256xf32>
    %8 = vector.broadcast %7 : vector<1x256xf32> to vector<16x256xf32>
    %9 = arith.addf %6, %8 : vector<16x256xf32>
    %cst_10 = arith.constant 0.000000e+00 : f32
    %10 = vector.broadcast %cst_10 : f32 to vector<16x256xf32>
    %11 = arith.maximumf %9, %10 : vector<16x256xf32>
    %12 = arith.truncf %11 : vector<16x256xf32> to vector<16x256xbf16>
    %c0_11 = arith.constant 0 : index
    %c0_12 = arith.constant 0 : index
    %13 = vector.load %arg6[%c0_11, %c0_12] : memref<256x128xbf16, #tpu.memory_space<vmem>>, vector<256x128xbf16>
    %cst_13 = arith.constant dense<0.000000e+00> : vector<16x128xf32>
    %14 = tpu.matmul %12, %13, %cst_13 {dimension_numbers = #tpu.dot_dimension_numbers<[1], [0], [0], [1], [0, 0, 1, 1], [], []>} : vector<16x256xbf16>, vector<256x128xbf16>, vector<16x128xf32> -> vector<16x128xf32>
    %c0_14 = arith.constant 0 : index
    %c0_15 = arith.constant 0 : index
    %15 = vector.load %arg7[%c0_14, %c0_15] : memref<1x128xf32, #tpu.memory_space<vmem>>, vector<1x128xf32>
    %16 = vector.broadcast %15 : vector<1x128xf32> to vector<16x128xf32>
    %17 = arith.addf %14, %16 : vector<16x128xf32>
    %18 = arith.truncf %17 : vector<16x128xf32> to vector<16x128xbf16>
    %c0_16 = arith.constant 0 : index
    %c0_17 = arith.constant 0 : index
    %19 = vector.load %arg8[%c0_16, %c0_17] : memref<16x128xbf16, #tpu.memory_space<vmem>>, vector<16x128xbf16>
    tpu.vector_store %arg8[%c0_16, %c0_17], %18 {strides = array<i32>} : memref<16x128xbf16, #tpu.memory_space<vmem>>, vector<16x128xbf16>,
    return
  }
  func.func @transform_0(%arg0: i32) -> (i32, i32) {
    %c0_i32 = arith.constant 0 : i32
    %c0_i32_0 = arith.constant 0 : i32
    return %arg0, %c0_i32 : i32, i32
  }
  func.func @transform_1(%arg0: i32) -> (i32, i32) {
    %c0_i32 = arith.constant 0 : i32
    %c0_i32_0 = arith.constant 0 : i32
    return %arg0, %c0_i32 : i32, i32
  }
  func.func @transform_2(%arg0: i32) -> (i32, i32) {
    %c0_i32 = arith.constant 0 : i32
    %c0_i32_0 = arith.constant 0 : i32
    %c0_i32_1 = arith.constant 0 : i32
    return %c0_i32, %c0_i32_0 : i32, i32
  }
  func.func @transform_3(%arg0: i32) -> (i32, i32) {
    %c0_i32 = arith.constant 0 : i32
    %c0_i32_0 = arith.constant 0 : i32
    %c0_i32_1 = arith.constant 0 : i32
    return %c0_i32, %c0_i32_0 : i32, i32
  }
  func.func @transform_4(%arg0: i32) -> (i32, i32) {
    %c0_i32 = arith.constant 0 : i32
    %c0_i32_0 = arith.constant 0 : i32
    %c0_i32_1 = arith.constant 0 : i32
    return %c0_i32, %c0_i32_0 : i32, i32
  }
  func.func @transform_5(%arg0: i32) -> (i32, i32) {
    %c0_i32 = arith.constant 0 : i32
    %c0_i32_0 = arith.constant 0 : i32
    %c0_i32_1 = arith.constant 0 : i32
    return %c0_i32, %c0_i32_0 : i32, i32
  }
  func.func @transform_6(%arg0: i32) -> (i32, i32) {
    %c0_i32 = arith.constant 0 : i32
    %c0_i32_0 = arith.constant 0 : i32
    %c0_i32_1 = arith.constant 0 : i32
    return %c0_i32, %c0_i32_0 : i32, i32
  }
  func.func @transform_7(%arg0: i32) -> (i32, i32) {
    %c0_i32 = arith.constant 0 : i32
    %c0_i32_0 = arith.constant 0 : i32
    return %arg0, %c0_i32 : i32, i32
  }
}

</mosaic_0001>

<bundles_post_ra>
// kernel: emotic_forward.1
= control target key start
LH: loop header
LB: loop body
LE: loop exit
PB: predicated region body
PF: predicated region fallthrough
CT: control target
= control target key end

     0   :  { %v686_v1 = vmov 0   ;;  %v323_v51 = vlaneseq  ;;  %s886_s3 = inlined_call_operand.vmem [shape: bf16[128,256], index: 3, kind: input, shape index: {}]   ;;  %s887_s2 = inlined_call_operand.vmem [shape: bf16[128,256], index: 2, kind: input, shape index: {}]   ;;  %s888_s1 = inlined_call_operand.vmem [shape: bf16[16,128], index: 1, kind: input, shape index: {}]   ;;  %s889_s0 = inlined_call_operand.vmem [shape: bf16[16,128], index: 0, kind: input, shape index: {}]   ;;  %s890_s5 = inlined_call_operand.vmem [shape: bf16[256,128], index: 5, kind: input, shape index: {}]   ;;  %s891_s4 = inlined_call_operand.vmem [shape: f32[1,256], index: 4, kind: input, shape index: {}]   ;;  %s892_s6 = inlined_call_operand.vmem [shape: f32[1,128], index: 6, kind: input, shape index: {}]   ;;  %s893_s7 = inlined_call_operand.vmem [shape: bf16[16,128], index: 7, kind: output, shape index: {}]  }
   0x1   :  { %v620_v0 = vld [vmem:[%s886_s3 + $0x4] ss:$8 sps:$4 sm:$0xff]   ;;  %181 = vmatprep.mubr.bf16.mxu0 %v686_v1  ;;  %v622_v2 = vld [vmem:[%s886_s3] ss:$8 sps:$4 sm:$0xff]   ;;  %v623_v3 = vld [vmem:[%s886_s3 + $0x14] ss:$8 sps:$4 sm:$0xff]  }
   0x2   :  { %149 = vmatprep.subr.bf16.mxu0 %v620_v0  ;;  %v625_v4 = vld [vmem:[%s886_s3 + $0x10] ss:$8 sps:$4 sm:$0xff]   ;;  %v626_v5 = vld [vmem:[%s886_s3 + $0x24] ss:$8 sps:$4 sm:$0xff]   ;;  %v628_v6 = vld [vmem:[%s886_s3 + $0x20] ss:$8 sps:$4 sm:$0xff]  }
   0x3   :  { %150 = vmatpush1.bf16.msra.mxu0 %v622_v2  ;;  %v629_v7 = vld [vmem:[%s886_s3 + $0x34] ss:$8 sps:$4 sm:$0xff]   ;;  %v631_v8 = vld [vmem:[%s886_s3 + $0x30] ss:$8 sps:$4 sm:$0xff]   ;;  %v632_v9 = vld [vmem:[%s886_s3 + $0x44] ss:$8 sps:$4 sm:$0xff]  }
   0x4   :  { %151 = vmatprep.subr.bf16.mxu0 %v623_v3  ;;  %v634_v10 = vld [vmem:[%s886_s3 + $0x40] ss:$8 sps:$4 sm:$0xff]   ;;  %v635_v11 = vld [vmem:[%s886_s3 + $0x54] ss:$8 sps:$4 sm:$0xff]   ;;  %v637_v12 = vld [vmem:[%s886_s3 + $0x50] ss:$8 sps:$4 sm:$0xff]  }
   0x5   :  { %v638_v13 = vld [vmem:[%s886_s3 + $0x64] ss:$8 sps:$4 sm:$0xff]   ;;  %v640_v14 = vld [vmem:[%s886_s3 + $0x60] ss:$8 sps:$4 sm:$0xff]   ;;  %v641_v15 = vld [vmem:[%s886_s3 + $0x74] ss:$8 sps:$4 sm:$0xff]  }
   0x6   :  { %v670_v16 = vld [vmem:[%s890_s5 + $0x40] sm:$0xff]   ;;  %v643_v17 = vld [vmem:[%s886_s3 + $0x70] ss:$8 sps:$4 sm:$0xff]   ;;  %v672_v20 = vld [vmem:[%s890_s5 + $0x48] sm:$0xff]   ;;  %v324_v52 = vshrl.u32 %v323_v51, 7 }
   0x7   :  { %152 = vmatpush1.bf16.msra.mxu0 %v625_v4  ;;  %v671_v18 = vld [vmem:[%s890_s5] sm:$0xff]   ;;  %593 = vmatprep.subr.bf16.mxu1 %v670_v16  ;;  %v673_v21 = vld [vmem:[%s890_s5 + $0x8] sm:$0xff]   ;;  %v674_v22 = vld [vmem:[%s890_s5 + $0x50] sm:$0xff]  }
   0x8   :  { %153 = vmatprep.subr.bf16.mxu0 %v626_v5  ;;  %v646_v19 = vld [vmem:[%s887_s2 + $0x4] ss:$8 sps:$4 sm:$0xff]   ;;  %594 = vmatpush3.bf16.msra.mxu1 %v671_v18  ;;  %v644_v23 = vld [vmem:[%s887_s2] ss:$8 sps:$4 sm:$0xff]   ;;  %v650_v25 = vld [vmem:[%s887_s2 + $0x14] ss:$8 sps:$4 sm:$0xff]  }
   0x9   :  { %595 = vmatprep.subr.bf16.mxu1 %v672_v20  ;;  %v647_v24 = vld [vmem:[%s888_s1] sm:$0xff]   ;;  %v675_v26 = vld [vmem:[%s890_s5 + $0x10] sm:$0xff]   ;;  %v676_v28 = vld [vmem:[%s890_s5 + $0x58] sm:$0xff]   ;;  %v325_v53 = vsub.s32 0, %v324_v52  ;;  %v329_v55 = vsub.s32 1, %v324_v52 }
   0xa   :  { %v648_v27 = vld [vmem:[%s887_s2 + $0x10] ss:$8 sps:$4 sm:$0xff]   ;;  %v653_v29 = vld [vmem:[%s887_s2 + $0x24] ss:$8 sps:$4 sm:$0xff]   ;;  %v651_v32 = vld [vmem:[%s887_s2 + $0x20] ss:$8 sps:$4 sm:$0xff]  }
   0xb   :  { %154 = vmatpush1.bf16.msra.mxu0 %v628_v6  ;;  %v677_v30 = vld [vmem:[%s890_s5 + $0x18] sm:$0xff]   ;;  %v678_v31 = vld [vmem:[%s890_s5 + $0x60] sm:$0xff]   ;;  %v680_v35 = vld [vmem:[%s890_s5 + $0x68] sm:$0xff]  }
   0xc   :  { %155 = vmatprep.subr.bf16.mxu0 %v629_v7  ;;  %596 = vmatpush3.bf16.msra.mxu1 %v673_v21  ;;  %v656_v33 = vld [vmem:[%s887_s2 + $0x34] ss:$8 sps:$4 sm:$0xff]   ;;  %v679_v34 = vld [vmem:[%s890_s5 + $0x20] sm:$0xff]   ;;  %v654_v36 = vld [vmem:[%s887_s2 + $0x30] ss:$8 sps:$4 sm:$0xff]  }
   0xd   :  { %597 = vmatprep.subr.bf16.mxu1 %v674_v22  ;;  %v659_v37 = vld [vmem:[%s887_s2 + $0x44] ss:$8 sps:$4 sm:$0xff]   ;;  %v657_v38 = vld [vmem:[%s887_s2 + $0x40] ss:$8 sps:$4 sm:$0xff]   ;;  %v662_v39 = vld [vmem:[%s887_s2 + $0x54] ss:$8 sps:$4 sm:$0xff]  }
   0xe   :  { %v660_v40 = vld [vmem:[%s887_s2 + $0x50] ss:$8 sps:$4 sm:$0xff]   ;;  %v665_v41 = vld [vmem:[%s887_s2 + $0x64] ss:$8 sps:$4 sm:$0xff]   ;;  %v663_v42 = vld [vmem:[%s887_s2 + $0x60] ss:$8 sps:$4 sm:$0xff]  }
   0xf   :  { %156 = vmatpush1.bf16.msra.mxu0 %v631_v8  ;;  %v668_v43 = vld [vmem:[%s887_s2 + $0x74] ss:$8 sps:$4 sm:$0xff]   ;;  %v666_v44 = vld [vmem:[%s887_s2 + $0x70] ss:$8 sps:$4 sm:$0xff]   ;;  %v669_v45 = vld [vmem:[%s889_s0] sm:$0xff]  }
  0x10   :  { %157 = vmatprep.subr.bf16.mxu0 %v632_v9  ;;  %598 = vmatpush3.bf16.msra.mxu1 %v675_v26  ;;  %v681_v46 = vld [vmem:[%s890_s5 + $0x28] sm:$0xff]   ;;  %v682_v47 = vld [vmem:[%s890_s5 + $0x70] sm:$0xff]   ;;  %v684_v49 = vld [vmem:[%s890_s5 + $0x78] sm:$0xff]  }
  0x11   :  { %599 = vmatprep.subr.bf16.mxu1 %v676_v28  ;;  %v683_v48 = vld [vmem:[%s890_s5 + $0x30] sm:$0xff]   ;;  %v685_v50 = vld [vmem:[%s890_s5 + $0x38] sm:$0xff]   ;;  %v321_v54 = vld [vmem:[%s891_s4] sm:$0x3] }
  0x12   :  { %v326_v56 = vrot.slane %v321_v54, %v325_v53  ;;  %v330_v57 = vrot.slane %v321_v54, %v329_v55 }
  0x13   :  { %158 = vmatpush1.bf16.msra.mxu0 %v634_v10 }
  0x14   :  { %159 = vmatprep.subr.bf16.mxu0 %v635_v11  ;;  %600 = vmatpush3.bf16.msra.mxu1 %v677_v30 }
  0x15   :  { %601 = vmatprep.subr.bf16.mxu1 %v678_v31 }
  0x17   :  { %160 = vmatpush1.bf16.msra.mxu0 %v637_v12  ;;  %v567_v12 = vld [vmem:[%s892_s6] ss:$0 sm:$0xff] }
  0x18   :  { %161 = vmatprep.subr.bf16.mxu0 %v638_v13  ;;  %602 = vmatpush3.bf16.msra.mxu1 %v679_v34 }
  0x19   :  { %603 = vmatprep.subr.bf16.mxu1 %v680_v35 }
  0x1b   :  { %162 = vmatpush1.bf16.msra.mxu0 %v640_v14 }
  0x1c   :  { %163 = vmatprep.subr.bf16.mxu0 %v641_v15  ;;  %604 = vmatpush3.bf16.msra.mxu1 %v681_v46 }
  0x1d   :  { %605 = vmatprep.subr.bf16.mxu1 %v682_v47 }
  0x1f   :  { %164 = vmatpush1.bf16.msra.mxu0 %v643_v17 }
  0x20   :  { %278 = vmatprep.subr.bf16.mxu0 %v646_v19  ;;  %606 = vmatpush3.bf16.msra.mxu1 %v683_v48 }
  0x21   :  { %607 = vmatprep.subr.bf16.mxu1 %v684_v49 }
  0x22   :  { %182 = vmatmul.mubr.bf16.vlgmr.msra.gmra.mrb[0].mxu0 %v647_v24 }
  0x23   :  { %279 = vmatpush1.bf16.msra.mxu0 %v644_v23  ;;  %310 = vmatprep.mubr.bf16.mxu0 %v686_v1 }
  0x24   :  { %280 = vmatprep.subr.bf16.mxu0 %v650_v25  ;;  %608 = vmatpush3.bf16.msra.mxu1 %v685_v50 }
  0x27   :  { %281 = vmatpush1.bf16.msra.mxu0 %v648_v27 }
  0x28   :  { %282 = vmatprep.subr.bf16.mxu0 %v653_v29 }
  0x2b   :  { %283 = vmatpush1.bf16.msra.mxu0 %v651_v32 }
  0x2c   :  { %284 = vmatprep.subr.bf16.mxu0 %v656_v33 }
  0x2f   :  { %285 = vmatpush1.bf16.msra.mxu0 %v654_v36 }
  0x30   :  { %286 = vmatprep.subr.bf16.mxu0 %v659_v37 }
  0x33   :  { %287 = vmatpush1.bf16.msra.mxu0 %v657_v38 }
  0x34   :  { %288 = vmatprep.subr.bf16.mxu0 %v662_v39 }
  0x37   :  { %289 = vmatpush1.bf16.msra.mxu0 %v660_v40 }
  0x38   :  { %290 = vmatprep.subr.bf16.mxu0 %v665_v41 }
  0x3b   :  { %291 = vmatpush1.bf16.msra.mxu0 %v663_v42 }
  0x3c   :  { %292 = vmatprep.subr.bf16.mxu0 %v668_v43 }
  0x3f   :  { %293 = vmatpush1.bf16.msra.mxu0 %v666_v44 }
  0x42   :  { %311 = vmatmul.mubr.bf16.vlgmr.msra.gmra.mrb[0].mxu0 %v669_v45 }
 0x115   :  { %v312_v58 = vpop.f32.mrb[0].mxu0 }
 0x116   :  { %v333_v59 = vadd.f32 %v326_v56, %v312_v58  ;;  %v314_v60 = vpop.f32.mrb[1].mxu0 }
 0x117   :  { %v334_v61 = vadd.f32 %v330_v57, %v314_v60  ;;  %v316_v62 = vpop.f32.mrb[2].mxu0 }
 0x118   :  { %v335_v63 = vadd.f32 %v326_v56, %v316_v62  ;;  %v318_v0 = vpop.f32.mrb[3].mxu0  ;;  %v337_v2 = vmax.f32 %v333_v59, 0.0 }
 0x119   :  { %v336_v1 = vadd.f32 %v330_v57, %v318_v0  ;;  %v338_v4 = vmax.f32 %v334_v61, 0.0 }
 0x11a   :  { %v339_v3 = vmax.f32 %v335_v63, 0.0 }
 0x11b   :  { %v340_v5 = vmax.f32 %v336_v1, 0.0 }
 0x11c   :  { %v341_v6 = vpack.c.bf16 %v339_v3, %v337_v2 }
 0x11d   :  { %v342_v7 = vpack.c.bf16 %v340_v5, %v338_v4 }
 0x11f   :  { %510 = vmatprep.mubr.bf16.mxu1 %v342_v7 }
 0x120   :  { %511 = vmatmul.mubr.bf16.vlgmr.msra.gmra.mrb[0].mxu1 %v341_v6 }
 0x1f3   :  { %v609_v8 = vpop.f32.mrb[0].mxu1 }
 0x1f4   :  { %v610_v9 = vpop.f32.mrb[1].mxu1 }
 0x1f5   :  { %v611_v10 = vadd.f32 %v610_v9, %v609_v8  ;;  %v612_v11 = vpop.f32.mrb[2].mxu1 }
 0x1f6   :  { %v613_v13 = vpop.f32.mrb[3].mxu1 }
 0x1f7   :  { %v614_v14 = vadd.f32 %v613_v13, %v612_v11  ;;  %v513_v15 = vadd.f32 %v611_v10, %v567_v12 }
 0x1f9   :  { %v516_v16 = vadd.f32 %v614_v14, %v567_v12 }
 0x1fb   :  { %v591_v17 = vpack.c.bf16 %v516_v16, %v513_v15 }
 0x1fd   :  { %592 = vst [vmem:[%s893_s7] sm:$0xff] %v591_v17  }

</bundles_post_ra>
